<compile_context>
chip_gen: v6e
topology: v6e:2x2x1
jax: 0.10.0
libtpu: 0.0.40
codegen_flags: <defaults>
</compile_context>

<pallas_src>
import functools

import jax
import jax.numpy as jnp
from jax.experimental import pallas as pl
from jax.experimental.pallas import tpu as pltpu


def _round_up(a: int, b: int) -> int:
    return ((a + b - 1) // b) * b


def _rmsnorm_kernel(x_ref, w_ref, o_ref, *, eps: float, dim: int):
    # x_ref: (row_tile, dim_p) block, w_ref: (1, dim_p), o_ref: (row_tile, dim_p)
    x = x_ref[...].astype(jnp.float32)
    # Sum of squares over the lane axis; padded lanes are zero so this equals the
    # sum over the true `dim` lanes. Divide by the *actual* dim for the mean.
    ss = jnp.sum(x * x, axis=-1, keepdims=True)
    inv = jax.lax.rsqrt(ss * (1.0 / dim) + eps)
    o_ref[...] = w_ref[...].astype(jnp.float32) * (x * inv)


def rmsnorm(x, weights, eps: float = 1e-5, row_tile: int = 256,
            vmem_budget_bytes: int = 40 * 1024 * 1024):
    """RMSNorm over the last axis of x. Returns float32, same shape as x."""
    orig_shape = x.shape
    dim = orig_shape[-1]
    rows = 1
    for s in orig_shape[:-1]:
        rows *= int(s)
    rows = max(rows, 1)

    in_itemsize = jnp.dtype(x.dtype).itemsize
    # Sublane packing factor for the input dtype (f32->8, bf16->16, int8/fp8->32).
    pack = {4: 8, 2: 16, 1: 32}.get(in_itemsize, 8)

    # Lane-dense last dim: pad to a multiple of 128 (no-op for production Llama dims).
    dim_p = max(128, _round_up(dim, 128))

    # --- row_tile selection ---------------------------------------------------
    # Align to sublane packing.
    row_tile = max(pack, _round_up(row_tile, pack))
    # Cap so the double-buffered (input + f32 output) tiles fit the VMEM budget,
    # which is conservative for v7x's 64 MiB VMEM and v5e's small default limit.
    bytes_per_row = dim_p * (in_itemsize + 4)        # in tile + f32 out tile, per row
    max_rows_in_budget = vmem_budget_bytes // (2 * bytes_per_row)  # x2 double buffer
    max_rows_in_budget = max(pack, (max_rows_in_budget // pack) * pack)
    row_tile = min(row_tile, max_rows_in_budget)
    # Don't make the tile bigger than the (packed-rounded) problem itself.
    row_tile = min(row_tile, _round_up(rows, pack))

    rows_p = _round_up(rows, row_tile)
    grid = (rows_p // row_tile,)

    # --- pad inputs (zero padding is numerically inert; padded region is sliced off) ---
    x2d = x.reshape(rows, dim)
    if rows_p != rows or dim_p != dim:
        x2d = jnp.pad(x2d, ((0, rows_p - rows), (0, dim_p - dim)))
    w2d = weights.reshape(1, dim)
    if dim_p != dim:
        w2d = jnp.pad(w2d, ((0, 0), (0, dim_p - dim)))

    # Explicit scoped-VMEM limit sized to the tiles (double-buffered in/out + weights).
    tile_bytes = (2 * row_tile * dim_p * in_itemsize       # input, double-buffered
                  + 2 * row_tile * dim_p * 4               # f32 output, double-buffered
                  + 2 * dim_p * 4)                         # weights
    vmem_limit = max(tile_bytes + (2 << 20), 16 << 20)

    kernel = functools.partial(_rmsnorm_kernel, eps=float(eps), dim=int(dim))

    out2d = pl.pallas_call(
        kernel,
        out_shape=jax.ShapeDtypeStruct((rows_p, dim_p), jnp.float32),
        grid_spec=pltpu.PrefetchScalarGridSpec(
            num_scalar_prefetch=0,
            grid=grid,
            in_specs=[
                pl.BlockSpec((row_tile, dim_p), lambda i: (i, 0)),
                pl.BlockSpec((1, dim_p), lambda i: (0, 0)),
            ],
            out_specs=pl.BlockSpec((row_tile, dim_p), lambda i: (i, 0)),
        ),
        compiler_params=pltpu.CompilerParams(
            dimension_semantics=("parallel",),
            vmem_limit_bytes=int(vmem_limit),
        ),
    )(x2d, w2d)

    if rows_p != rows or dim_p != dim:
        out2d = out2d[:rows, :dim]
    return out2d.reshape(orig_shape)


def rmsnorm_ref(x, weights, eps=1e-5):
    xf = x.astype(jnp.float32)
    inv = jax.lax.rsqrt(jnp.mean(xf * xf, axis=-1, keepdims=True) + eps)
    return weights.astype(jnp.float32) * (xf * inv)


if __name__ == "__main__":
    key = jax.random.PRNGKey(0)
    batch, seq, hidden = 2, 8, 32

    x = jax.random.normal(key, (batch, seq, hidden), dtype=jnp.float32)
    # nn.Parameter(torch.ones(dim)) -> deterministic ones init
    weights = jnp.ones((hidden,), dtype=jnp.float32)

    out = rmsnorm(x, weights, eps=1e-5)
    out = jax.block_until_ready(out)

    ref = rmsnorm_ref(x, weights, eps=1e-5)
    assert out.shape == x.shape
    assert out.dtype == jnp.float32
    assert jnp.allclose(out, ref, atol=1e-5, rtol=1e-5), "mismatch vs reference"

    # Also exercise a non-divisible, lane-dense shape to verify padding path.
    x2 = jax.random.normal(jax.random.PRNGKey(1), (3, 37, 256), dtype=jnp.float32)
    w2 = jnp.ones((256,), dtype=jnp.float32)
    out2 = jax.block_until_ready(rmsnorm(x2, w2))
    assert jnp.allclose(out2, rmsnorm_ref(x2, w2), atol=1e-5, rtol=1e-5)

    print("KERNEL_OK")
</pallas_src>

<mosaic_0001>
module attributes {stable_mosaic.version = 11 : i64} {
  func.func @_rmsnorm_kernel(%arg0: i32, %arg1: memref<16x128xf32, #tpu.memory_space<vmem>>, %arg2: memref<1x128xf32, #tpu.memory_space<vmem>>, %arg3: memref<16x128xf32, #tpu.memory_space<vmem>>) attributes {dimension_semantics = [#tpu.dimension_semantics<parallel>], iteration_bounds = array<i64: 1>, scalar_prefetch = 0 : i64, scratch_operands = 0 : i64, tpu.core_type = #tpu.core_type<tc>, window_params = [{transform_indices = @transform_0, window_bounds = array<i64: 16, 128>}, {pipeline_mode = #tpu.pipeline_mode<synchronous>, transform_indices = @transform_1, window_bounds = array<i64: 1, 128>}, {transform_indices = @transform_2, window_bounds = array<i64: 16, 128>}]} {
    %c0 = arith.constant 0 : index
    %c0_0 = arith.constant 0 : index
    %0 = vector.load %arg1[%c0, %c0_0] : memref<16x128xf32, #tpu.memory_space<vmem>>, vector<16x128xf32>
    %1 = arith.mulf %0, %0 : vector<16x128xf32>
    %cst = arith.constant dense<0.000000e+00> : vector<16xf32>
    %2 = vector.multi_reduction <add>, %1, %cst [1] : vector<16x128xf32> to vector<16xf32>
    %3 = vector.shape_cast %2 : vector<16xf32> to vector<16x1xf32>
    %cst_1 = arith.constant 3.125000e-02 : f32
    %4 = vector.broadcast %cst_1 : f32 to vector<16x1xf32>
    %5 = arith.mulf %3, %4 : vector<16x1xf32>
    %cst_2 = arith.constant 9.99999974E-6 : f32
    %6 = vector.broadcast %cst_2 : f32 to vector<16x1xf32>
    %7 = arith.addf %5, %6 : vector<16x1xf32>
    %8 = math.rsqrt %7 : vector<16x1xf32>
    %c0_3 = arith.constant 0 : index
    %c0_4 = arith.constant 0 : index
    %9 = vector.load %arg2[%c0_3, %c0_4] : memref<1x128xf32, #tpu.memory_space<vmem>>, vector<1x128xf32>
    %10 = vector.broadcast %8 : vector<16x1xf32> to vector<16x128xf32>
    %11 = arith.mulf %0, %10 : vector<16x128xf32>
    %12 = vector.broadcast %9 : vector<1x128xf32> to vector<16x128xf32>
    %13 = arith.mulf %12, %11 : vector<16x128xf32>
    %c0_5 = arith.constant 0 : index
    %c0_6 = arith.constant 0 : index
    %14 = vector.load %arg3[%c0_5, %c0_6] : memref<16x128xf32, #tpu.memory_space<vmem>>, vector<16x128xf32>
    tpu.vector_store %arg3[%c0_5, %c0_6], %13 {strides = array<i32>} : memref<16x128xf32, #tpu.memory_space<vmem>>, vector<16x128xf32>,
    return
  }
  func.func @transform_0(%arg0: i32) -> (i32, i32) {
    %c0_i32 = arith.constant 0 : i32
    %c0_i32_0 = arith.constant 0 : i32
    return %arg0, %c0_i32 : i32, i32
  }
  func.func @transform_1(%arg0: i32) -> (i32, i32) {
    %c0_i32 = arith.constant 0 : i32
    %c0_i32_0 = arith.constant 0 : i32
    %c0_i32_1 = arith.constant 0 : i32
    return %c0_i32, %c0_i32_0 : i32, i32
  }
  func.func @transform_2(%arg0: i32) -> (i32, i32) {
    %c0_i32 = arith.constant 0 : i32
    %c0_i32_0 = arith.constant 0 : i32
    return %arg0, %c0_i32 : i32, i32
  }
}

</mosaic_0001>

<bundles_post_ra>
// kernel: tpu_custom_call.1
= control target key start
LH: loop header
LB: loop body
LE: loop exit
PB: predicated region body
PF: predicated region fallthrough
CT: control target
= control target key end

     0   :  { %7 = vsyncpa [#allocation3], 0  ;;  %s157_s0 = inlined_call_operand.hbm [shape: f32[16,128], index: 0, kind: input, shape index: {}]   ;;  %s158_s1 = inlined_call_operand.vmem [shape: f32[1,128], index: 1, kind: input, shape index: {}]   ;;  %s159_s2 = inlined_call_operand.hbm [shape: f32[16,128], index: 2, kind: output, shape index: {}]  }
   0x1   :  { %8 = vsyncpa [#allocation4], 0  ;;  %s123_s9 = smov [#allocation2]  }
   0x2   :  { %s14_s10 = sshll.u32 %s123_s9, 4  ;;  %s15_s10 = int_to_ptr.vmem [resolvable:$true] %s14_s10 }
   0x3   :  { %s87_s11 = scalar_lea.vmem %s15_s10, 256  ;;  %p92_p1 = scmp.lt.s32.totalorder %s15_s10, %s15_s10 }
   0x4   :  { %p88_p0 = scmp.ne.s32.totalorder %s15_s10, %s87_s11  ;;  %p93_p2 = scmp.lt.s32.totalorder %s87_s11, %s87_s11 }
   0x6   :  { %p94_p3 = por %p93_p2, %p92_p1 }
   0x8   :  { %p95_p4 = pnand %p94_p3, %p88_p0 }
   0xa   :  { %98 = shalt.err (!%p95_p4)
}
   0xb   :  { %s124_s12 = smov 128   ;;  %s125_s13 = smov 8  }
   0xc   :  { %20 = dma.hbm_to_vmem [thread:$0]  %s157_s0, 256, %s15_s10, [#allocation3], %s124_s12, %s124_s12, %s125_s13  }
   0xd   :  { %119 = dma.done.wait [#allocation3], 256  }
   0xe   :  { %120 = vsyncadd [#allocation3], 4294967040  ;;  %v26_v0 = vld [vmem:[#allocation2] sm:$0xff]  ;;  %v27_v1 = vld [vmem:[#allocation2 + $0x8] sm:$0xff]  ;;  %s126_s0 = smov [#allocation5]  }
   0xf   :  { %v28_v2 = vmul.f32 %v26_v0, %v26_v0  ;;  %v29_v3 = vmul.f32 %v27_v1, %v27_v1  ;;  %v70_v11 = vld [vmem:[%s158_s1] ss:$0 sm:$0xff]  ;;  %s58_s18 = sshll.u32 %s126_s0, 4  ;;  %s59_s18 = int_to_ptr.vmem [resolvable:$true] %s58_s18 }
  0x10   :  { %s99_s19 = scalar_lea.vmem %s59_s18, 256  ;;  %p104_p6 = scmp.lt.s32.totalorder %s59_s18, %s59_s18 }
  0x11   :  { %30 = vadd.xlane.f32.xlu0 %v28_v2  ;;  %p100_p5 = scmp.ne.s32.totalorder %s59_s18, %s99_s19  ;;  %p105_p7 = scmp.lt.s32.totalorder %s99_s19, %s99_s19 }
  0x13   :  { %p106_p8 = por %p105_p7, %p104_p6 }
  0x15   :  { %32 = vadd.xlane.f32.xlu0 %v29_v3  ;;  %p107_p9 = pnand %p106_p8, %p100_p5 }
  0x9a   :  { %v31_v4 = vpop.xlane.xlu0 %30 }
  0x9b   :  { %v34_v5 = vmul.f32 0.03125, %v31_v4 }
  0x9d   :  { %v36_v6 = vadd.f32 1e-05, %v34_v5 }
  0x9e   :  { %v33_v7 = vpop.xlane.xlu0 %32 }
  0x9f   :  { %75 = vrsqrt.f32 %v36_v6  ;;  %v35_v8 = vmul.f32 0.03125, %v33_v7 }
  0xa1   :  { %v37_v9 = vadd.f32 1e-05, %v35_v8 }
  0xa3   :  { %77 = vrsqrt.f32 %v37_v9 }
  0xac   :  { %v76_v10 = vpop.eup %75 }
  0xad   :  { %v41_v12 = vmul.f32 %v76_v10, %v26_v0 }
  0xaf   :  { %v49_v13 = vmul.f32 %v70_v11, %v41_v12 }
  0xb0   :  { %v78_v14 = vpop.eup %77 }
  0xb1   :  { %v42_v15 = vmul.f32 %v78_v14, %v27_v1  ;;  %51 = vst [vmem:[#allocation5] sm:$0xff] %v49_v13 }
  0xb3   :  { %v50_v16 = vmul.f32 %v70_v11, %v42_v15 }
  0xb5   :  { %52 = vst [vmem:[#allocation5 + $0x8] sm:$0xff] %v50_v16 }
  0xb6   :  { %110 = shalt.err (!%p107_p9)
}
  0xb7   :  { %64 = dma.vmem_to_hbm [thread:$0]  %s59_s18, 256, %s159_s2, [#allocation4], %s124_s12, %s124_s12, %s125_s13  }
  0xb8   :  { %121 = dma.done.wait [#allocation4], 256  }
  0xb9   :  { %122 = vsyncadd [#allocation4], 4294967040 }
  0xba   :  { %68 = vsyncpa [#allocation3], 1 }
  0xbb   :  { %69 = vsyncpa [#allocation4], 1 }

</bundles_post_ra>
